<compile_context>
chip_gen: v6e
topology: v6e:2x2x1
jax: 0.10.0
libtpu: 0.0.40
codegen_flags: <defaults>
</compile_context>

<pallas_src>
import jax
import jax.numpy as jnp
from jax.experimental import pallas as pl
from jax.experimental.pallas import tpu as pltpu


def _round_up(x, m):
    return ((x + m - 1) // m) * m


def _sublane_tile(dtype):
    # Minimum second-minor tile for a packed dtype: 8 (f32), 16 (bf16), 32 (8-bit).
    return 8 * max(1, 4 // jnp.dtype(dtype).itemsize)


def _pick_tile(dim, requested, align):
    """Pick a tile <= requested that covers `dim`.

    If dim <= requested the tile is the full dim (always a legal TPU block and
    no out-of-bounds region).  Otherwise the tile is `align`-aligned and the
    last block may be partial (handled by in-kernel masking / OOB dropping).
    Returns (tile, n_tiles)."""
    requested = max(requested, align)
    if dim <= requested:
        return dim, 1
    n = -(-dim // requested)                 # ceil
    tile = _round_up(-(-dim // n), align)    # balanced, aligned tiles
    n = -(-dim // tile)
    return tile, n


def _make_kernel(*, n_k, K, tk, mask_k_edge, use_scratch, use_sparse):
    def kernel(*refs):
        if use_sparse:
            nz_ref, eff_ref = refs[0], refs[1]
            refs = refs[2:]
        adj_ref, emb_ref, out_ref = refs[0], refs[1], refs[2]
        acc_ref = refs[3] if use_scratch else out_ref

        i = pl.program_id(0)
        k = pl.program_id(2)

        @pl.when(k == 0)
        def _init():
            acc_ref[...] = jnp.zeros_like(acc_ref)

        def compute():
            a = adj_ref[...]
            b = emb_ref[...]
            if a.dtype != b.dtype:
                a = a.astype(b.dtype)  # e.g. fp8-streamed adjacency -> bf16
            if mask_k_edge:
                # Zero the ragged K edge of the (never-padded) adjacency tile;
                # a no-op for all but the last k block.
                col = jax.lax.broadcasted_iota(jnp.int32, a.shape, 1)
                a = jnp.where(col < (K - k * tk), a, jnp.zeros_like(a))
            acc_ref[...] += jnp.dot(a, b, preferred_element_type=jnp.float32)

        if use_sparse:
            @pl.when(nz_ref[i * n_k + k] != 0)
            def _compute_nonzero():
                compute()
        else:
            compute()

        if use_scratch:
            @pl.when(k == n_k - 1)
            def _finalize():
                out_ref[...] = acc_ref[...].astype(out_ref.dtype)

    return kernel


def gcn_layer(adj, embeds, *, tm=1024, tk=512, tn=512,
              compute_dtype=jnp.bfloat16, adj_dtype=None,
              skip_empty_tiles=True):
    """Equivalent of GCNLayer.forward(adj, embeds, flag=True) == adj @ embeds."""
    M, K = adj.shape
    K2, D = embeds.shape
    assert K == K2, "adj cols must match embeds rows"

    out_dtype = embeds.dtype

    # --- dtype handling (f32 accumulation regardless of compute dtype) -------
    emb_cd = jnp.dtype(compute_dtype) if compute_dtype is not None else jnp.dtype(embeds.dtype)
    if adj_dtype is not None:
        adj_cd = jnp.dtype(adj_dtype)
    elif compute_dtype is not None:
        adj_cd = jnp.dtype(compute_dtype)
    else:
        adj_cd = jnp.dtype(adj.dtype)

    adj_c = adj if adj.dtype == adj_cd else adj.astype(adj_cd)
    emb_c = embeds if embeds.dtype == emb_cd else embeds.astype(emb_cd)

    use_scratch = jnp.dtype(out_dtype) != jnp.dtype(jnp.float32)

    in_b = adj_cd.itemsize
    emb_b = emb_cd.itemsize
    out_b = jnp.dtype(out_dtype).itemsize

    # --- generation-aware VMEM budget ----------------------------------------
    try:
        phys_vmem = int(pltpu.get_tpu_info().vmem_capacity_bytes)
    except Exception:
        phys_vmem = 64 * 1024 * 1024  # conservative (v7x per-TensorCore)
    budget = (phys_vmem * 3) // 4

    def footprint(tm_, tk_, tn_):
        f = 2 * tm_ * tk_ * in_b + 2 * tk_ * tn_ * emb_b + 2 * tm_ * tn_ * out_b
        if use_scratch:
            f += tm_ * tn_ * 4
        return f

    # Sublane alignment for the second-minor block dims, packed-dtype aware.
    align_m = max(_sublane_tile(adj_cd), _sublane_tile(out_dtype))
    if use_scratch:
        align_m = max(align_m, _sublane_tile(jnp.float32))

    # Keep >= 2 row tiles when possible so both v7x TensorCores get a
    # "parallel" grid step (cost-free on single-core v5e/v6e).
    tm_req = max(align_m, tm)
    if M > 2 * align_m:
        tm_req = min(tm_req, _round_up(-(-M // 2), align_m))
    tk_req = max(128, tk)
    tn_req = max(128, tn if tn is not None else 512)

    # Grow tk to the full reduction width when it comfortably fits VMEM:
    # n_k == 1, no accumulator read-modify-write, inputs streamed exactly once.
    tm_e0, _ = _pick_tile(M, tm_req, align_m)
    tn_e0, _ = _pick_tile(D, tn_req, 128)
    if K > tk_req and footprint(tm_e0, _round_up(K, 128), tn_e0) <= budget // 2:
        tk_req = _round_up(K, 128)

    # Final tile selection; shrink requests if ever over the VMEM budget.
    while True:
        tm_e, n_i = _pick_tile(M, tm_req, align_m)
        tk_e, n_k = _pick_tile(K, tk_req, 128)
        tn_e, n_j = _pick_tile(D, tn_req, 128)
        if footprint(tm_e, tk_e, tn_e) <= budget:
            break
        if tm_req > align_m and tm_e >= max(tk_e, tn_e):
            tm_req = max(align_m, tm_req // 2)
        elif tk_req > 128 and tk_e >= tn_e:
            tk_req = max(128, tk_req // 2)
        elif tn_req > 128:
            tn_req = max(128, tn_req // 2)
        elif tm_req > align_m:
            tm_req = max(align_m, tm_req // 2)
        elif tk_req > 128:
            tk_req = max(128, tk_req // 2)
        else:
            break

    # Ragged K edge: mask adj columns in-kernel, zero-pad only the small
    # embeds array so padded rows contribute exactly 0.  (adj is NOT padded.)
    K_cov = tk_e * n_k
    mask_k_edge = K_cov != K
    if mask_k_edge:
        emb_c = jnp.pad(emb_c, ((0, K_cov - K), (0, 0)))

    # Block-sparse skip: per-(row-tile, k-tile) nonzero bitmap plus a running
    # "effective k" so empty tiles re-use the previously fetched block (no new
    # DMA) and skip the matmul entirely.
    use_sparse = bool(skip_empty_tiles) and (n_i * n_k) <= (1 << 15)
    if use_sparse:
        M_cov = tm_e * n_i
        nzb = adj_c != 0
        if (M_cov != M) or (K_cov != K):
            nzb = jnp.pad(nzb, ((0, M_cov - M), (0, K_cov - K)))
        nz_blocks = jnp.any(nzb.reshape(n_i, tm_e, n_k, tk_e), axis=(1, 3))
        ks = jax.lax.broadcasted_iota(jnp.int32, (n_i, n_k), 1)
        eff = jnp.maximum(
            jax.lax.cummax(jnp.where(nz_blocks, ks, -1), axis=1), 0
        ).astype(jnp.int32)
        nz_flat = nz_blocks.astype(jnp.int32).reshape(-1)
        eff_flat = eff.reshape(-1)

    kernel = _make_kernel(n_k=n_k, K=K, tk=tk_e, mask_k_edge=mask_k_edge,
                          use_scratch=use_scratch, use_sparse=use_sparse)
    scratch = [pltpu.VMEM((tm_e, tn_e), jnp.float32)] if use_scratch else []

    if use_sparse:
        in_specs = [
            pl.BlockSpec((tm_e, tk_e),
                         lambda i, j, k, nz, eff: (i, eff[i * n_k + k])),
            pl.BlockSpec((tk_e, tn_e),
                         lambda i, j, k, nz, eff: (eff[i * n_k + k], j)),
        ]
        out_specs = pl.BlockSpec((tm_e, tn_e), lambda i, j, k, nz, eff: (i, j))
        num_prefetch = 2
        args = (nz_flat, eff_flat, adj_c, emb_c)
    else:
        in_specs = [
            pl.BlockSpec((tm_e, tk_e), lambda i, j, k: (i, k)),
            pl.BlockSpec((tk_e, tn_e), lambda i, j, k: (k, j)),
        ]
        out_specs = pl.BlockSpec((tm_e, tn_e), lambda i, j, k: (i, j))
        num_prefetch = 0
        args = (adj_c, emb_c)

    vmem_limit = int(min(max(2 * footprint(tm_e, tk_e, tn_e), 32 * 1024 * 1024),
                         budget))

    out = pl.pallas_call(
        kernel,
        out_shape=jax.ShapeDtypeStruct((M, D), out_dtype),
        grid_spec=pltpu.PrefetchScalarGridSpec(
            num_scalar_prefetch=num_prefetch,
            grid=(n_i, n_j, n_k),              # reduction axis last
            in_specs=in_specs,
            out_specs=out_specs,
            scratch_shapes=scratch,
        ),
        compiler_params=pltpu.CompilerParams(
            dimension_semantics=("parallel", "parallel", "arbitrary"),
            vmem_limit_bytes=vmem_limit,
        ),
    )(*args)
    return out


if __name__ == "__main__":
    key = jax.random.PRNGKey(0)
    k_adj, k_mask, k_emb, k_emb2 = jax.random.split(key, 4)

    # Test 1: 256 nodes, 128-dim embeddings.  The bottom half of the graph has
    # no edges, so a whole (row-tile, k-tile) block is empty and the
    # block-sparse skip path is exercised.
    N, D = 256, 128
    vals = jax.random.uniform(k_adj, (N, N), dtype=jnp.float32)
    mask = jax.random.uniform(k_mask, (N, N)) < 0.05      # ~5% nonzeros
    adj = jnp.where(mask, vals, 0.0)
    adj = adj.at[N // 2:, :].set(0.0)                      # empty row tiles
    row_sum = jnp.maximum(adj.sum(axis=1, keepdims=True), 1e-6)
    adj = adj / row_sum                                    # row-normalized, as GCNs use
    embeds = jax.random.normal(k_emb, (N, D), dtype=jnp.float32)
    ref = adj @ embeds

    # Default path: bf16 streams, f32 accumulation, block-sparse skipping.
    out = jax.block_until_ready(gcn_layer(adj, embeds))
    assert out.shape == (N, D)
    assert jnp.allclose(out, ref, atol=3e-2, rtol=3e-2)

    # Strict f32 path (exact reference-parity numerics).
    out_f32 = jax.block_until_ready(gcn_layer(adj, embeds, compute_dtype=None))
    assert jnp.allclose(out_f32, ref, atol=1e-4, rtol=1e-4)

    # Test 2: ragged shapes (200 nodes, 72-dim) exercising partial edge blocks
    # with no padding of adj at all.
    N2, D2 = 200, 72
    adj2 = adj[:N2, :N2]
    embeds2 = jax.random.normal(k_emb2, (N2, D2), dtype=jnp.float32)
    ref2 = adj2 @ embeds2
    out2 = jax.block_until_ready(gcn_layer(adj2, embeds2))
    assert out2.shape == (N2, D2)
    assert jnp.allclose(out2, ref2, atol=3e-2, rtol=3e-2)

    print("KERNEL_OK")
</pallas_src>

<mosaic_0001>
module attributes {stable_mosaic.version = 11 : i64} {
  func.func @kernel(%arg0: i32, %arg1: i32, %arg2: i32, %arg3: memref<2xi32, #tpu.memory_space<smem>>, %arg4: memref<2xi32, #tpu.memory_space<smem>>, %arg5: memref<128x256xbf16, #tpu.memory_space<vmem>>, %arg6: memref<256x128xbf16, #tpu.memory_space<vmem>>, %arg7: memref<128x128xf32, #tpu.memory_space<vmem>>) attributes {dimension_semantics = [#tpu.dimension_semantics<parallel>, #tpu.dimension_semantics<parallel>, #tpu.dimension_semantics<arbitrary>], iteration_bounds = array<i64: 2, 1, 1>, scalar_prefetch = 2 : i64, scratch_operands = 0 : i64, tpu.core_type = #tpu.core_type<tc>, window_params = [{transform_indices = @transform_0, window_bounds = array<i64: 128, 256>}, {transform_indices = @transform_1, window_bounds = array<i64: 256, 128>}, {transform_indices = @transform_2, window_bounds = array<i64: 128, 128>}]} {
    %c0_i32 = arith.constant 0 : i32
    %0 = arith.cmpi eq, %arg2, %c0_i32 : i32
    %1 = arith.extui %0 : i1 to i32
    %c0_i32_0 = arith.constant 0 : i32
    %2 = arith.cmpi ne, %1, %c0_i32_0 : i32
    scf.if %2 {
      %cst = arith.constant 0.000000e+00 : f32
      %10 = vector.broadcast %cst : f32 to vector<128x128xf32>
      %c0 = arith.constant 0 : index
      %c0_3 = arith.constant 0 : index
      %11 = vector.load %arg7[%c0, %c0_3] : memref<128x128xf32, #tpu.memory_space<vmem>>, vector<128x128xf32>
      tpu.vector_store %arg7[%c0, %c0_3], %10 {strides = array<i32>} : memref<128x128xf32, #tpu.memory_space<vmem>>, vector<128x128xf32>,
    } else {
    }
    %c1_i32 = arith.constant 1 : i32
    %3 = arith.muli %arg0, %c1_i32 : i32
    %4 = arith.addi %3, %arg2 : i32
    %5 = arith.index_cast %4 : i32 to index
    %6 = memref.load %arg3[%5] : memref<2xi32, #tpu.memory_space<smem>>
    %c0_i32_1 = arith.constant 0 : i32
    %7 = arith.cmpi ne, %6, %c0_i32_1 : i32
    %8 = arith.extui %7 : i1 to i32
    %c0_i32_2 = arith.constant 0 : i32
    %9 = arith.cmpi ne, %8, %c0_i32_2 : i32
    scf.if %9 {
      %c0 = arith.constant 0 : index
      %c0_3 = arith.constant 0 : index
      %10 = vector.load %arg5[%c0, %c0_3] : memref<128x256xbf16, #tpu.memory_space<vmem>>, vector<128x256xbf16>
      %c0_4 = arith.constant 0 : index
      %c0_5 = arith.constant 0 : index
      %11 = vector.load %arg6[%c0_4, %c0_5] : memref<256x128xbf16, #tpu.memory_space<vmem>>, vector<256x128xbf16>
      %c0_6 = arith.constant 0 : index
      %c0_7 = arith.constant 0 : index
      %12 = vector.load %arg7[%c0_6, %c0_7] : memref<128x128xf32, #tpu.memory_space<vmem>>, vector<128x128xf32>
      %cst = arith.constant dense<0.000000e+00> : vector<128x128xf32>
      %13 = tpu.matmul %10, %11, %cst {dimension_numbers = #tpu.dot_dimension_numbers<[1], [0], [0], [1], [0, 0, 1, 1], [], []>} : vector<128x256xbf16>, vector<256x128xbf16>, vector<128x128xf32> -> vector<128x128xf32>
      %14 = arith.addf %12, %13 : vector<128x128xf32>
      %c0_8 = arith.constant 0 : index
      %c0_9 = arith.constant 0 : index
      %15 = vector.load %arg7[%c0_8, %c0_9] : memref<128x128xf32, #tpu.memory_space<vmem>>, vector<128x128xf32>
      tpu.vector_store %arg7[%c0_8, %c0_9], %14 {strides = array<i32>} : memref<128x128xf32, #tpu.memory_space<vmem>>, vector<128x128xf32>,
    } else {
    }
    return
  }
  func.func @transform_0(%arg0: i32, %arg1: i32, %arg2: i32, %arg3: memref<2xi32, #tpu.memory_space<smem>>, %arg4: memref<2xi32, #tpu.memory_space<smem>>) -> (i32, i32) {
    %c1_i32 = arith.constant 1 : i32
    %0 = arith.muli %arg0, %c1_i32 : i32
    %1 = arith.addi %0, %arg2 : i32
    %2 = arith.index_cast %1 : i32 to index
    %3 = memref.load %arg4[%2] : memref<2xi32, #tpu.memory_space<smem>>
    %c0_i32 = arith.constant 0 : i32
    return %arg0, %3 : i32, i32
  }
  func.func @transform_1(%arg0: i32, %arg1: i32, %arg2: i32, %arg3: memref<2xi32, #tpu.memory_space<smem>>, %arg4: memref<2xi32, #tpu.memory_space<smem>>) -> (i32, i32) {
    %c1_i32 = arith.constant 1 : i32
    %0 = arith.muli %arg0, %c1_i32 : i32
    %1 = arith.addi %0, %arg2 : i32
    %2 = arith.index_cast %1 : i32 to index
    %3 = memref.load %arg4[%2] : memref<2xi32, #tpu.memory_space<smem>>
    %c0_i32 = arith.constant 0 : i32
    return %3, %arg1 : i32, i32
  }
  func.func @transform_2(%arg0: i32, %arg1: i32, %arg2: i32, %arg3: memref<2xi32, #tpu.memory_space<smem>>, %arg4: memref<2xi32, #tpu.memory_space<smem>>) -> (i32, i32) {
    %c0_i32 = arith.constant 0 : i32
    return %arg0, %arg1 : i32, i32
  }
}

</mosaic_0001>

<bundles_post_ra>
// kernel: tpu_custom_call.1
= control target key start
LH: loop header
LB: loop body
LE: loop exit
PB: predicated region body
PF: predicated region fallthrough
CT: control target
= control target key end

     0   :  { %s1307_s15 = smov [#allocation3]   ;;  %s1753_s0 = inlined_call_operand.hbm [shape: s32[2], index: 0, kind: input, shape index: {}]   ;;  %s1754_s2 = inlined_call_operand.hbm [shape: bf16[256,256], index: 2, kind: input, shape index: {}]   ;;  %s1755_s3 = inlined_call_operand.hbm [shape: bf16[256,128], index: 3, kind: input, shape index: {}]   ;;  %s1756_s4 = inlined_call_operand.hbm [shape: f32[256,128], index: 4, kind: output, shape index: {}]   ;;  %s1757_s1 = inlined_call_operand.vmem [shape: s32[2], index: 1, kind: input, shape index: {}]  }
   0x1   :  { %10 = dma.hbm_to_smem %s1753_s0, 16, %s1307_s15, [#allocation2] }
   0x2   :  { %s11_s20 = sshll.u32 %s1757_s1, 4  ;;  %s12_s20 = int_to_ptr.vmem [resolvable:$true] %s11_s20 }
   0x3   :  { %s1103_s21 = scalar_lea.vmem %s12_s20, 16  ;;  %p1108_p1 = scmp.lt.s32.totalorder %s12_s20, %s12_s20 }
   0x4   :  { %p1104_p0 = scmp.ne.s32.totalorder %s12_s20, %s1103_s21  ;;  %p1109_p2 = scmp.lt.s32.totalorder %s1103_s21, %s1103_s21 }
   0x6   :  { %p1110_p3 = por %p1109_p2, %p1108_p1 }
   0x8   :  { %p1111_p4 = pnand %p1110_p3, %p1104_p0 }
   0xa   :  { %1114 = shalt.err (!%p1111_p4)  }
   0xb   :  { %s1308_s22 = smov [#allocation4]  }
   0xc   :  { %14 = dma.vmem_to_smem %s12_s20, 16, %s1308_s22, [#allocation2] }
   0xd   :  { %1245 = dma.done.wait [#allocation2], 32 }
   0xe   :  { %1246 = vsyncadd [#allocation2], 4294967264 }
   0xf   :  { %16 = sfence }
  0x10   :  { %17 = vsyncpa [#allocation6], 0 }
  0x11   :  { %19 = vsyncpa [#allocation6 + $0x1], 0 }
  0x12   :  { %20 = vsyncpa [#allocation9], 0 }
  0x13   :  { %22 = vsyncpa [#allocation9 + $0x1], 0 }
  0x14   :  { %23 = vsyncpa [#allocation7], 0 }
  0x15   :  { %25 = vsyncpa [#allocation7 + $0x1], 0  ;;  %s1350_s0 = smov 0   ;;  %s1352_s1 = smov 0  }
  0x16   :  { %s1354_s23 = smov 0   ;;  %s1356_s24 = smov 0  }
  0x17   :  { %s1358_s25 = smov 0   ;;  %s1360_s26 = smov 0  }
  0x18   :  { %s1362_s27 = smov 0   ;;  %s1364_s28 = smov 0  }
  0x19   :  { %s1366_s29 = smov 0   ;;  %s1368_s30 = smov 0  }
  0x1a   :  { %s1370_s5 = smov 0   ;;  %s1372_s6 = smov 0  }
  0x1b LB: > { %1768 = sst [smem:[#allocation19_spill]] %s1261_s0  ;;  %s786_s7 = sadd.s32 4294967295, %s1305_s6   ;;  %s1305_s6 = sphi %s1372_s6, %s31_s6   ;;  %s1301_s5 = sphi %s1370_s5, %s1809_s5   ;;  %s1297_s30 = sphi %s1368_s30, %s1808_s30   ;;  %s1293_s29 = sphi %s1366_s29, %s1807_s29   ;;  %s1289_s28 = sphi %s1364_s28, %s1806_s28   ;;  %s1285_s27 = sphi %s1362_s27, %s1805_s27   ;;  %s1281_s26 = sphi %s1360_s26, %s1804_s26   ;;  %s1277_s25 = sphi %s1358_s25, %s1803_s25   ;;  %s1273_s24 = sphi %s1356_s24, %s1802_s24   ;;  %s1269_s23 = sphi %s1354_s23, %s1797_s23   ;;  %s1265_s1 = sphi %s1352_s1, %s1801_s1   ;;  %s1261_s0 = sphi %s1350_s0, %s1800_s0  }
  0x1c   : > { %1769 = sst [smem:[#allocation20_spill]] %s1269_s23  ;;  %s787_s8 = sadd.s32 4294967294, %s1305_s6  }
  0x1d   : > { %1770 = sst [smem:[#allocation21_spill]] %s1293_s29  ;;  %s50_s9 = sadd.s32 1, %s1301_s5 }
  0x1e   : > { %s55_s10 = sld [smem:[#allocation4 + %s1301_s5]]  ;;  %p52_p5 = scmp.ge.s32.totalorder %s50_s9, 2 }
  0x1f   : > { %s63_s11 = sadd.s32 1, %s1293_s29  ;;  %p70_p6 = scmp.ne.s32.totalorder %s1293_s29, %s1289_s28 }
  0x20   : > { %p1763_p7 = scmp.eq.s32.totalorder %s1305_s6, 0  ;;  %s1811_s9 = smov (%p52_p5, %s50_s9), 0 }
  0x21   : > { %p76_p9 = scmp.ne.s32.totalorder %s1289_s28, %s1285_s27  ;;  %s57_s13 = sld [smem:[#allocation4 + %s1811_s9]] }
  0x22   : > { %p1420_p8 = por %p1763_p7, %p70_p6  ;;  %s58_s14 = ssub.s32 %s1301_s5, %s1811_s9 }
  0x23   : > { %p1428_p10 = scmp.eq.s32.totalorder %s786_s7, 0  ;;  %p121_p11 = scmp.eq.s32.totalorder %s58_s14, 0 }
  0x24   : > { %s123_s16 = sadd.s32 1, %s1269_s23  ;;  %p133_p12 = scmp.ne.s32.totalorder %s1269_s23, %s1265_s1 }
  0x25   : > { %s1772_s15 = scalar_select %p1428_p10, 1, 0 }
  0x26   : > { %p1437_p13 = por %p1428_p10, %p76_p9  ;;  %p134_p0 = scmp.eq.s32.totalorder %s786_s7, 1 }
  0x27   : > { %s1442_s18 = scalar_select %p121_p11, %s1269_s23, %s123_s16  }
  0x28   : > { %s1773_s17 = scalar_select %p1437_p13, 1, 0 }
  0x29   : > { %1774 = sst [smem:[#allocation22_spill]] %s1442_s18  ;;  %p1444_p1 = por %p134_p0, %p133_p12 }
  0x2a   : > { %p139_p2 = scmp.ne.s32.totalorder %s1265_s1, %s1261_s0  ;;  %s59_s20 = ssub.s32 %s55_s10, %s57_s13 }
  0x2b   : > { %s1775_s19 = scalar_select %p1444_p1, 1, 0 }
  0x2c   : > { %p140_p3 = scmp.eq.s32.totalorder %s787_s8, 1  ;;  %s60_s21 = sor.u32 %s59_s20, %s58_s14 }
  0x2d   : > { %p61_p5 = scmp.eq.s32.totalorder %s60_s21, 0  ;;  %p1762_p9 = scmp.lt.s32.totalorder %s1305_s6, 2 }
  0x2e   : > { %p1451_p6 = por %p140_p3, %p139_p2  ;;  %s160_s27 = sand.u32 1, %s1293_s29  }
  0x2f   : > { %s1458_s7 = scalar_select %p61_p5, %s1293_s29, %s63_s11  }
  0x30   : > { %s1776_s22 = scalar_select %p1451_p6, 1, 0 }
  0x31   : > { %1778 = sst [smem:[#allocation24_spill]] %s1458_s7  ;;  %s790_s16 = sshll.u32 %s160_s27, 7 }
  0x32   : > { %1777 = sst [smem:[#allocation23_spill]] %s1776_s22  ;;  %s840_s18 = sshll.u32 %s1301_s5, 5 }
  0x33   : > { %s923_s8 = scalar_select %p1420_p8, [#allocation4], [#allocation11] }
  0x34   : > { %s924_s10 = scalar_select %p1420_p8, %s1301_s5, 0 }
  0x35   : > { %s1813_s8 = smov (!%p1762_p9, %s923_s8), [#allocation13]  ;;  %s164_s13 = scalar_lea.vmem [#allocation5], %s790_s16 }
  0x36   : > { %s1815_s10 = smov (!%p1762_p9, %s924_s10), 0  ;;  %s176_s14 = sshll.u32 %s164_s13, 4  ;;  %s1478_s14 = int_to_ptr.vmem [resolvable:$true] %s176_s14 }
  0x37   : > { %p1474_p11 = pnand %p1762_p9, %p1420_p8  ;;  %s166_s11 = sld [smem:[%s1813_s8 + %s1815_s10]] }
  0x38   : > { %p798_p12 = scmp.ge.s32.totalorder %s1305_s6, 1  ;;  %p208_p0 = scmp.lt.s32.totalorder %s1305_s6, 3 }
  0x39   : > { %s1487_s13 = sld [smem:[#allocation4 + %s1301_s5]]  ;;  %s1497_s10 = scalar_lea.sflag [#allocation6], %s160_s27 }
  0x3a   : > { %p1482_p2 = pnand %p798_p12, %p208_p0  ;;  %s1495_s8 = sld [smem:[#allocation4 + %s1811_s9]] }
  0x3b   : > { %p1117_p3 = pneg %p1474_p11 }
  0x3c   : > { %s1780_s21 = scalar_select %p1482_p2, 1, 0 }
  0x3d   : > { %s792_s7 = sshll.u32 %s166_s11, 1 }
  0x3e   : > { %s173_s29 = sadd.s32 %s840_s18, %s792_s7  ;;  %s1120_s7 = scalar_lea.hbm %s1754_s2, 4096 }
  0x3f   : > { %s794_s16 = sshll.u32 %s173_s29, 6 }
  0x40   : > { %s1492_s22 = scalar_lea.hbm %s1754_s2, %s794_s16 }
  0x41   : > { %s1115_s0 = scalar_lea.hbm %s1492_s22, 2048  ;;  %p1121_p0 = scmp.lt.s32.totalorder %s1492_s22, %s1754_s2 }
  0x42   : > { %p1116_p8 = scmp.ne.s32.totalorder %s1492_s22, %s1115_s0  ;;  %p1122_p4 = scmp.lt.s32.totalorder %s1120_s7, %s1115_s0 }
  0x44   : > { %p1118_p5 = pnand %p1117_p3, %p1116_p8  ;;  %p1123_p9 = por %p1122_p4, %p1121_p0 }
  0x46   : > { %p1119_p12 = pneg %p1118_p5 }
  0x48   : > { %p1124_p7 = pnand %p1123_p9, %p1119_p12 }
  0x4a   : > { %1127 = shalt.err (!%p1124_p7)
}
  0x4b   : > { %s1128_s27 = scalar_lea.vmem %s1478_s14, 2048  ;;  %s1309_s16 = smov [#allocation5]  }
  0x4c   : > { %p1129_p6 = scmp.ne.s32.totalorder %s1478_s14, %s1128_s27  ;;  %s1133_s12 = sshll.u32 %s1309_s16, 4  ;;  %s1134_s12 = int_to_ptr.vmem [resolvable:$false] %s1133_s12 }
  0x4d   : > { %s1135_s29 = scalar_lea.vmem %s1134_s12, 4096  ;;  %p1136_p5 = scmp.lt.s32.totalorder %s1478_s14, %s1134_s12 }
  0x4e   : > { %p1131_p1 = pnand %p1129_p6, %p1117_p3  ;;  %p1137_p13 = scmp.lt.s32.totalorder %s1135_s29, %s1128_s27 }
  0x50   : > { %p1132_p8 = pneg %p1131_p1  ;;  %p1138_p2 = por %p1137_p13, %p1136_p5 }
  0x52   : > { %p1139_p10 = pnand %p1138_p2, %p1132_p8 }
  0x54   : > { %1142 = shalt.err (!%p1139_p10)
}
  0x55   : > { %s1310_s0 = smov 128   ;;  %s1311_s18 = smov 8  }
  0x56   : > { %938 = dma.hbm_to_vmem [thread:$0]  (!%p1474_p11), %s1492_s22, 2048, %s1478_s14, %s1497_s10, %s1310_s0, %s1310_s0, %s1311_s18  }
  0x57   : > { %p102_p7 = scmp.ne.s32.totalorder %s1281_s26, %s1277_s25  ;;  %p108_p10 = scmp.ne.s32.totalorder %s1277_s25, %s1273_s24 }
  0x58   : > { %s186_s7 = sand.u32 1, %s1281_s26   ;;  %p1781_p13 = scmp.eq.s32.totalorder %s1305_s6, 0 }
  0x59   : > { %p1782_p4 = scmp.ne.s32.totalorder %s1772_s15, 0  ;;  %s795_s11 = sshll.u32 %s186_s7, 7 }
  0x5a   : > { %p104_p1 = por %p102_p7, %p1781_p13  ;;  %s90_s27 = ssub.s32 %s1487_s13, %s1495_s8 }
  0x5b   : > { %p1527_p6 = por %p108_p10, %p1782_p4  ;;  %s95_s16 = sadd.s32 1, %s1281_s26 }
  0x5c   : > { %p93_p9 = scmp.eq.s32.totalorder %s90_s27, 0  ;;  %p1784_p2 = scmp.lt.s32.totalorder %s1305_s6, 2 }
  0x5d   : > { %s1783_s23 = scalar_select %p1527_p6, 1, 0 }
  0x5e   : > { %s926_s12 = scalar_select %p104_p1, [#allocation4], [#allocation12] }
  0x5f   : > { %s1535_s29 = scalar_select %p93_p9, %s1281_s26, %s95_s16  }
  0x60   : > { %s927_s20 = scalar_select %p104_p1, %s1301_s5, 0 }
  0x61   : > { %s1817_s12 = smov (!%p1784_p2, %s926_s12), [#allocation14]  ;;  %p1785_p11 = pmov %p1784_p2 }
  0x62   : > { %p1786_p3 = pmov %p1784_p2  ;;  %s190_s22 = scalar_lea.vmem [#allocation8], %s795_s11 }
  0x63   : > { %s1819_s20 = smov (!%p1785_p11, %s927_s20), 0  ;;  %s200_s14 = sshll.u32 %s190_s22, 4  ;;  %s1548_s14 = int_to_ptr.vmem [resolvable:$true] %s200_s14 }
  0x64   : > { %p1544_p12 = pnand %p1786_p3, %p104_p1  ;;  %s192_s15 = sld [smem:[%s1817_s12 + %s1819_s20]] }
  0x65   : > { %s1555_s18 = scalar_lea.sflag [#allocation9], %s186_s7  ;;  %s1148_s12 = scalar_lea.hbm %s1755_s3, 2048 }
  0x66   : > { %p1145_p8 = pneg %p1544_p12 }
  0x6a   : > { %s841_s13 = sshll.u32 %s192_s15, 11 }
  0x6b   : > { %s1553_s0 = scalar_lea.hbm %s1755_s3, %s841_s13 }
  0x6c   : > { %s1143_s27 = scalar_lea.hbm %s1553_s0, 2048  ;;  %p1149_p10 = scmp.lt.s32.totalorder %s1553_s0, %s1755_s3 }
  0x6d   : > { %p1144_p0 = scmp.ne.s32.totalorder %s1553_s0, %s1143_s27  ;;  %p1150_p13 = scmp.lt.s32.totalorder %s1148_s12, %s1143_s27 }
  0x6f   : > { %p1146_p5 = pnand %p1145_p8, %p1144_p0  ;;  %p1151_p1 = por %p1150_p13, %p1149_p10 }
  0x71   : > { %p1147_p7 = pneg %p1146_p5 }
  0x73   : > { %p1152_p4 = pnand %p1151_p1, %p1147_p7 }
  0x75   : > { %1155 = shalt.err (!%p1152_p4)
}
  0x76   : > { %s1156_s7 = scalar_lea.vmem %s1548_s14, 2048  ;;  %s1312_s22 = smov [#allocation8]  }
  0x77   : > { %p1157_p9 = scmp.ne.s32.totalorder %s1548_s14, %s1156_s7  ;;  %s1161_s13 = sshll.u32 %s1312_s22, 4  ;;  %s1162_s13 = int_to_ptr.vmem [resolvable:$false] %s1161_s13 }
  0x78   : > { %s1163_s8 = scalar_lea.vmem %s1162_s13, 4096  ;;  %p1164_p3 = scmp.lt.s32.totalorder %s1548_s14, %s1162_s13 }
  0x79   : > { %p1159_p2 = pnand %p1157_p9, %p1145_p8  ;;  %p1165_p0 = scmp.lt.s32.totalorder %s1163_s8, %s1156_s7 }
  0x7b   : > { %p1160_p11 = pneg %p1159_p2  ;;  %p1166_p5 = por %p1165_p0, %p1164_p3 }
  0x7d   : > { %p1167_p6 = pnand %p1166_p5, %p1160_p11 }
  0x7f   : > { %1170 = shalt.err (!%p1167_p6)
}
  0x80   : > { %s1313_s10 = smov 64   ;;  %s1314_s27 = smov 4  }
  0x81   : > { %943 = dma.hbm_to_vmem [thread:$0]  (!%p1544_p12), %s1553_s0, 2048, %s1548_s14, %s1555_s18, %s1313_s10, %s1313_s10, %s1314_s27  }
  0x82   : > { %p1788_p8 = scmp.ne.s32.totalorder %s1780_s21, 0 }
  0x83   : > { %s214_s11 = sand.u32 (!%p1788_p8), 1, %s1289_s28   ;;  %p1789_p7 = scmp.ne.s32.totalorder (!%p1788_p8), %s1773_s17, 0 }
  0x84   : > { %212 = sbr.rel (%p1788_p8) target bundleno = 441 (0x1b9), region = 28  ;;  %s799_s16 = sshll.u32 (!%p1788_p8), %s214_s11, 7 }
  0x85   : > { %s215_s12 = scalar_lea.sflag (!%p1788_p8), [#allocation6], %s214_s11  ;;  %s1579_s20 = scalar_lea.vmem (!%p1788_p8), [#allocation5], %s799_s16 }
  0x89   : > { %1248 = dma.done.wait (%p1789_p7), %s215_s12, 2048  }
  0x8a   : > { %1250 = vsyncadd (%p1789_p7), %s215_s12, 4294965248  ;;  %s223_s15 = sand.u32 1, %s1277_s25   ;;  %p1790_p6 = scmp.ne.s32.totalorder %s1783_s23, 0 }
  0x8b   : > { %s800_s24 = sshll.u32 %s223_s15, 7  ;;  %s224_s14 = scalar_lea.sflag [#allocation9], %s223_s15 }
  0x8c   : > { %s1586_s0 = scalar_lea.vmem [#allocation8], %s800_s24 }
  0x8d   : > { %1252 = dma.done.wait (%p1790_p6), %s224_s14, 2048  }
  0x8e   : > { %1254 = vsyncadd (%p1790_p6), %s224_s14, 4294965248  ;;  %s250_s21 = sand.u32 1, %s1265_s1   ;;  %s283_s18 = sld [smem:[#allocation3 + %s1297_s30]]  ;;  %v1315_v0 = vmov 0.0  }
  0x8f   : > { %s801_s17 = sshll.u32 %s250_s21, 7 }
  0x90   : > { %s1596_s7 = scalar_lea.vmem [#allocation10], %s801_s17 }
  0x91   : > { %266 = vst [vmem:[%s1596_s7] sm:$0xff] %v1315_v0  ;;  %267 = vst [vmem:[%s1596_s7 + $0x8] sm:$0xff] %v1315_v0 }
  0x92   : > { %268 = vst [vmem:[%s1596_s7 + $0x10] sm:$0xff] %v1315_v0  ;;  %269 = vst [vmem:[%s1596_s7 + $0x18] sm:$0xff] %v1315_v0 }
  0x93   : > { %270 = vst [vmem:[%s1596_s7 + $0x20] sm:$0xff] %v1315_v0  ;;  %271 = vst [vmem:[%s1596_s7 + $0x28] sm:$0xff] %v1315_v0 }
  0x94   : > { %272 = vst [vmem:[%s1596_s7 + $0x30] sm:$0xff] %v1315_v0  ;;  %273 = vst [vmem:[%s1596_s7 + $0x38] sm:$0xff] %v1315_v0  ;;  %p802_p12 = scmp.eq.s32.totalorder %s283_s18, 0 }
  0x95   : > { %274 = vst [vmem:[%s1596_s7 + $0x40] sm:$0xff] %v1315_v0  ;;  %275 = vst [vmem:[%s1596_s7 + $0x48] sm:$0xff] %v1315_v0 }
  0x96   : > { %276 = vst [vmem:[%s1596_s7 + $0x50] sm:$0xff] %v1315_v0  ;;  %277 = vst [vmem:[%s1596_s7 + $0x58] sm:$0xff] %v1315_v0  ;;  %287 = sbr.rel (%p802_p12) target bundleno = 416 (0x1a0), region = 44 }
  0x97   : > { %278 = vst [vmem:[%s1596_s7 + $0x60] sm:$0xff] %v1315_v0  ;;  %279 = vst [vmem:[%s1596_s7 + $0x68] sm:$0xff] %v1315_v0 }
  0x98   : > { %280 = vst [vmem:[%s1596_s7 + $0x70] sm:$0xff] %v1315_v0  ;;  %281 = vst [vmem:[%s1596_s7 + $0x78] sm:$0xff] %v1315_v0 }
  0x9b   : > { %v1055_v1 = vld [vmem:[%s1586_s0 + $0x78] sm:$0xff]   ;;  %v1057_v3 = vld [vmem:[%s1586_s0 + $0x70] sm:$0xff]   ;;  %v1059_v5 = vld [vmem:[%s1586_s0 + $0x68] sm:$0xff]  }
  0x9c   : > { %v1056_v2 = vld [vmem:[%s1586_s0 + $0x38] sm:$0xff]   ;;  %843 = vmatprep.subr.bf16.mxu0 %v1055_v1  ;;  %907 = vmatprep.subr.bf16.mxu1 %v1055_v1  ;;  %v1058_v4 = vld [vmem:[%s1586_s0 + $0x30] sm:$0xff]   ;;  %v1060_v6 = vld [vmem:[%s1586_s0 + $0x28] sm:$0xff]  }
  0x9d   : > { %844 = vmatpush3.bf16.msra.mxu0 %v1056_v2  ;;  %915 = vmatpush3.bf16.msra.mxu1 %v1056_v2  ;;  %v1061_v7 = vld [vmem:[%s1586_s0 + $0x60] sm:$0xff]   ;;  %v1063_v9 = vld [vmem:[%s1586_s0 + $0x58] sm:$0xff]   ;;  %v1065_v11 = vld [vmem:[%s1586_s0 + $0x50] sm:$0xff]  }
  0x9e   : > { %845 = vmatprep.subr.bf16.mxu0 %v1057_v3  ;;  %908 = vmatprep.subr.bf16.mxu1 %v1057_v3  ;;  %v1062_v8 = vld [vmem:[%s1586_s0 + $0x20] sm:$0xff]   ;;  %v1064_v10 = vld [vmem:[%s1586_s0 + $0x18] sm:$0xff]   ;;  %v1066_v14 = vld [vmem:[%s1586_s0 + $0x10] sm:$0xff]  }
  0x9f   : > { %v1073_v12 = vld [vmem:[%s1579_s20 + $0x4] ss:$8 sps:$4 sm:$0xff]   ;;  %v1071_v19 = vld [vmem:[%s1579_s20] ss:$8 sps:$4 sm:$0xff]   ;;  %v1077_v21 = vld [vmem:[%s1579_s20 + $0x14] ss:$8 sps:$4 sm:$0xff]  }
  0xa0   : > { %v1076_v13 = vld [vmem:[%s1579_s20 + $0x44] ss:$8 sps:$4 sm:$0xff]   ;;  %560 = vmatprep.mubr.bf16.mxu0 %v1073_v12  ;;  %v1074_v20 = vld [vmem:[%s1579_s20 + $0x40] ss:$8 sps:$4 sm:$0xff]   ;;  %v1079_v22 = vld [vmem:[%s1579_s20 + $0x54] ss:$8 sps:$4 sm:$0xff]  }
  0xa1   : > { %846 = vmatpush3.bf16.msra.mxu0 %v1058_v4  ;;  %916 = vmatpush3.bf16.msra.mxu1 %v1058_v4  ;;  %v1067_v15 = vld [vmem:[%s1586_s0 + $0x48] sm:$0xff]   ;;  %v1069_v17 = vld [vmem:[%s1586_s0 + $0x40] sm:$0xff]   ;;  %v1081_v23 = vld [vmem:[%s1579_s20 + $0x10] ss:$8 sps:$4 sm:$0xff]  }
  0xa2   : > { %847 = vmatprep.subr.bf16.mxu0 %v1059_v5  ;;  %909 = vmatprep.subr.bf16.mxu1 %v1059_v5  ;;  %v1068_v16 = vld [vmem:[%s1586_s0 + $0x8] sm:$0xff]   ;;  %v1070_v18 = vld [vmem:[%s1586_s0] sm:$0xff]   ;;  %v1082_v24 = vld [vmem:[%s1579_s20 + $0x50] ss:$8 sps:$4 sm:$0xff]  }
  0xa3   : > { %592 = vmatprep.mubr.bf16.mxu1 %v1076_v13  ;;  %v1083_v25 = vld [vmem:[%s1579_s20 + $0x24] ss:$8 sps:$4 sm:$0xff]   ;;  %v1087_v27 = vld [vmem:[%s1579_s20 + $0x20] ss:$8 sps:$4 sm:$0xff]   ;;  %v1089_v29 = vld [vmem:[%s1579_s20 + $0x34] ss:$8 sps:$4 sm:$0xff]  }
  0xa4   : > { %v1085_v26 = vld [vmem:[%s1579_s20 + $0x64] ss:$8 sps:$4 sm:$0xff]   ;;  %v1088_v28 = vld [vmem:[%s1579_s20 + $0x60] ss:$8 sps:$4 sm:$0xff]   ;;  %v1091_v30 = vld [vmem:[%s1579_s20 + $0x74] ss:$8 sps:$4 sm:$0xff]  }
  0xa5   : > { %848 = vmatpush3.bf16.msra.mxu0 %v1060_v6  ;;  %917 = vmatpush3.bf16.msra.mxu1 %v1060_v6  ;;  %v1093_v31 = vld [vmem:[%s1579_s20 + $0x30] ss:$8 sps:$4 sm:$0xff]   ;;  %v336_v35 = vld [vmem:[%s1596_s7] sm:$0xff]  ;;  %v337_v45 = vld [vmem:[%s1596_s7 + $0x8] sm:$0xff] }
  0xa6   : > { %849 = vmatprep.subr.bf16.mxu0 %v1061_v7  ;;  %910 = vmatprep.subr.bf16.mxu1 %v1061_v7  ;;  %v1094_v32 = vld [vmem:[%s1579_s20 + $0x70] ss:$8 sps:$4 sm:$0xff]   ;;  %v344_v37 = vld [vmem:[%s1596_s7 + $0x40] sm:$0xff]  ;;  %v345_v47 = vld [vmem:[%s1596_s7 + $0x48] sm:$0xff] }
  0xa7   : > { %v338_v55 = vld [vmem:[%s1596_s7 + $0x10] sm:$0xff]  ;;  %v339_v1 = vld [vmem:[%s1596_s7 + $0x18] sm:$0xff]  ;;  %v348_v13 = vld [vmem:[%s1596_s7 + $0x60] sm:$0xff] }
  0xa8   : > { %v346_v57 = vld [vmem:[%s1596_s7 + $0x50] sm:$0xff]  ;;  %v347_v3 = vld [vmem:[%s1596_s7 + $0x58] sm:$0xff] }
  0xa9   : > { %850 = vmatpush3.bf16.msra.mxu0 %v1062_v8  ;;  %918 = vmatpush3.bf16.msra.mxu1 %v1062_v8 }
  0xaa   : > { %851 = vmatprep.subr.bf16.mxu0 %v1063_v9  ;;  %911 = vmatprep.subr.bf16.mxu1 %v1063_v9 }
  0xad   : > { %852 = vmatpush3.bf16.msra.mxu0 %v1064_v10  ;;  %919 = vmatpush3.bf16.msra.mxu1 %v1064_v10 }
  0xae   : > { %853 = vmatprep.subr.bf16.mxu0 %v1065_v11  ;;  %912 = vmatprep.subr.bf16.mxu1 %v1065_v11  ;;  %v340_v11 = vld [vmem:[%s1596_s7 + $0x20] sm:$0xff] }
  0xb1   : > { %854 = vmatpush3.bf16.msra.mxu0 %v1066_v14  ;;  %920 = vmatpush3.bf16.msra.mxu1 %v1066_v14 }
  0xb2   : > { %855 = vmatprep.subr.bf16.mxu0 %v1067_v15  ;;  %913 = vmatprep.subr.bf16.mxu1 %v1067_v15 }
  0xb5   : > { %856 = vmatpush3.bf16.msra.mxu0 %v1068_v16  ;;  %921 = vmatpush3.bf16.msra.mxu1 %v1068_v16 }
  0xb6   : > { %857 = vmatprep.subr.bf16.mxu0 %v1069_v17  ;;  %914 = vmatprep.subr.bf16.mxu1 %v1069_v17 }
  0xb9   : > { %858 = vmatpush3.bf16.msra.mxu0 %v1070_v18  ;;  %922 = vmatpush3.bf16.msra.mxu1 %v1070_v18 }
  0xbc   : > { %561 = vmatmul.mubr.bf16.vlgmr.msra.gmra.mxu0 %v1071_v19  ;;  %593 = vmatmul.mubr.bf16.vlgmr.msra.gmra.mxu1 %v1074_v20 }
  0xbd   : > { %568 = vmatprep.mubr.bf16.mxu0 %v1077_v21  ;;  %600 = vmatprep.mubr.bf16.mxu1 %v1079_v22  ;;  %v341_v21 = vld [vmem:[%s1596_s7 + $0x28] sm:$0xff] }
  0xc4   : > { %569 = vmatmul.mubr.bf16.gmra.mxu0 %v1081_v23  ;;  %601 = vmatmul.mubr.bf16.gmra.mxu1 %v1082_v24  ;;  %v349_v23 = vld [vmem:[%s1596_s7 + $0x68] sm:$0xff] }
  0xc5   : > { %576 = vmatprep.mubr.bf16.mxu0 %v1083_v25  ;;  %608 = vmatprep.mubr.bf16.mxu1 %v1085_v26 }
  0xcc   : > { %577 = vmatmul.mubr.bf16.gmra.mxu0 %v1087_v27  ;;  %609 = vmatmul.mubr.bf16.gmra.mxu1 %v1088_v28 }
  0xcd   : > { %584 = vmatprep.mubr.bf16.mxu0 %v1089_v29  ;;  %616 = vmatprep.mubr.bf16.mxu1 %v1091_v30 }
  0xd4   : > { %585 = vmatmul.mubr.bf16.gmra.mxu0 %v1093_v31  ;;  %617 = vmatmul.mubr.bf16.gmra.mxu1 %v1094_v32  ;;  %v342_v31 = vld [vmem:[%s1596_s7 + $0x30] sm:$0xff] }
 0x17c   : > { %v859_v33 = vpop.f32.mrf.mxu0  ;;  %v883_v34 = vpop.f32.mrf.mxu1 }
 0x17e   : > { %v860_v36 = vpop.f32.mrf.mxu0  ;;  %v884_v38 = vpop.f32.mrf.mxu1 }
 0x17f   : > { %v861_v39 = vadd.f32 %v860_v36, %v859_v33  ;;  %v885_v40 = vadd.f32 %v884_v38, %v883_v34  ;;  %v350_v33 = vld [vmem:[%s1596_s7 + $0x70] sm:$0xff] }
 0x180   : > { %v862_v41 = vpop.f32.mrf.mxu0  ;;  %v886_v42 = vpop.f32.mrf.mxu1 }
 0x181   : > { %v625_v43 = vadd.f32 %v861_v39, %v336_v35  ;;  %v633_v44 = vadd.f32 %v885_v40, %v344_v37 }
 0x182   : > { %v863_v46 = vpop.f32.mrf.mxu0  ;;  %v887_v48 = vpop.f32.mrf.mxu1 }
 0x183   : > { %641 = vst [vmem:[%s1596_s7] sm:$0xff] %v625_v43  ;;  %649 = vst [vmem:[%s1596_s7 + $0x40] sm:$0xff] %v633_v44  ;;  %v864_v49 = vadd.f32 %v863_v46, %v862_v41  ;;  %v888_v50 = vadd.f32 %v887_v48, %v886_v42  ;;  %v343_v41 = vld [vmem:[%s1596_s7 + $0x38] sm:$0xff] }
 0x184   : > { %v865_v51 = vpop.f32.mrf.mxu0  ;;  %v889_v52 = vpop.f32.mrf.mxu1  ;;  %v351_v43 = vld [vmem:[%s1596_s7 + $0x78] sm:$0xff] }
 0x185   : > { %v626_v53 = vadd.f32 %v864_v49, %v337_v45  ;;  %v634_v54 = vadd.f32 %v888_v50, %v345_v47 }
 0x186   : > { %v866_v56 = vpop.f32.mrf.mxu0  ;;  %v890_v58 = vpop.f32.mrf.mxu1 }
 0x187   : > { %642 = vst [vmem:[%s1596_s7 + $0x8] sm:$0xff] %v626_v53  ;;  %650 = vst [vmem:[%s1596_s7 + $0x48] sm:$0xff] %v634_v54  ;;  %v867_v59 = vadd.f32 %v866_v56, %v865_v51  ;;  %v891_v60 = vadd.f32 %v890_v58, %v889_v52 }
 0x188   : > { %v868_v61 = vpop.f32.mrf.mxu0  ;;  %v892_v62 = vpop.f32.mrf.mxu1 }
 0x189   : > { %v627_v63 = vadd.f32 %v867_v59, %v338_v55  ;;  %v635_v0 = vadd.f32 %v891_v60, %v346_v57 }
 0x18a   : > { %v869_v2 = vpop.f32.mrf.mxu0  ;;  %v893_v4 = vpop.f32.mrf.mxu1 }
 0x18b   : > { %643 = vst [vmem:[%s1596_s7 + $0x10] sm:$0xff] %v627_v63  ;;  %651 = vst [vmem:[%s1596_s7 + $0x50] sm:$0xff] %v635_v0  ;;  %v870_v5 = vadd.f32 %v869_v2, %v868_v61  ;;  %v894_v6 = vadd.f32 %v893_v4, %v892_v62 }
 0x18c   : > { %v871_v7 = vpop.f32.mrf.mxu0  ;;  %v895_v8 = vpop.f32.mrf.mxu1 }
 0x18d   : > { %v628_v9 = vadd.f32 %v870_v5, %v339_v1  ;;  %v636_v10 = vadd.f32 %v894_v6, %v347_v3 }
 0x18e   : > { %v872_v12 = vpop.f32.mrf.mxu0  ;;  %v896_v14 = vpop.f32.mrf.mxu1 }
 0x18f   : > { %644 = vst [vmem:[%s1596_s7 + $0x18] sm:$0xff] %v628_v9  ;;  %652 = vst [vmem:[%s1596_s7 + $0x58] sm:$0xff] %v636_v10  ;;  %v873_v15 = vadd.f32 %v872_v12, %v871_v7  ;;  %v897_v16 = vadd.f32 %v896_v14, %v895_v8 }
 0x190   : > { %v874_v17 = vpop.f32.mrf.mxu0  ;;  %v898_v18 = vpop.f32.mrf.mxu1 }
 0x191   : > { %v629_v19 = vadd.f32 %v873_v15, %v340_v11  ;;  %v637_v20 = vadd.f32 %v897_v16, %v348_v13 }
 0x192   : > { %v875_v22 = vpop.f32.mrf.mxu0  ;;  %v899_v24 = vpop.f32.mrf.mxu1 }
 0x193   : > { %645 = vst [vmem:[%s1596_s7 + $0x20] sm:$0xff] %v629_v19  ;;  %653 = vst [vmem:[%s1596_s7 + $0x60] sm:$0xff] %v637_v20  ;;  %v876_v25 = vadd.f32 %v875_v22, %v874_v17  ;;  %v900_v26 = vadd.f32 %v899_v24, %v898_v18 }
 0x194   : > { %v877_v27 = vpop.f32.mrf.mxu0  ;;  %v901_v28 = vpop.f32.mrf.mxu1 }
 0x195   : > { %v630_v29 = vadd.f32 %v876_v25, %v341_v21  ;;  %v638_v30 = vadd.f32 %v900_v26, %v349_v23 }
 0x196   : > { %v878_v32 = vpop.f32.mrf.mxu0  ;;  %v902_v34 = vpop.f32.mrf.mxu1 }
 0x197   : > { %646 = vst [vmem:[%s1596_s7 + $0x28] sm:$0xff] %v630_v29  ;;  %654 = vst [vmem:[%s1596_s7 + $0x68] sm:$0xff] %v638_v30  ;;  %v879_v35 = vadd.f32 %v878_v32, %v877_v27  ;;  %v903_v36 = vadd.f32 %v902_v34, %v901_v28 }
 0x198   : > { %v880_v37 = vpop.f32.mrf.mxu0  ;;  %v904_v38 = vpop.f32.mrf.mxu1 }
 0x199   : > { %v631_v39 = vadd.f32 %v879_v35, %v342_v31  ;;  %v639_v40 = vadd.f32 %v903_v36, %v350_v33 }
 0x19a   : > { %v881_v42 = vpop.f32.mrf.mxu0  ;;  %v905_v44 = vpop.f32.mrf.mxu1 }
 0x19b   : > { %647 = vst [vmem:[%s1596_s7 + $0x30] sm:$0xff] %v631_v39  ;;  %655 = vst [vmem:[%s1596_s7 + $0x70] sm:$0xff] %v639_v40  ;;  %v882_v45 = vadd.f32 %v881_v42, %v880_v37  ;;  %v906_v46 = vadd.f32 %v905_v44, %v904_v38 }
 0x19d   : > { %v632_v47 = vadd.f32 %v882_v45, %v343_v41  ;;  %v640_v48 = vadd.f32 %v906_v46, %v351_v43 }
 0x19f   : > { %648 = vst [vmem:[%s1596_s7 + $0x38] sm:$0xff] %v632_v47  ;;  %656 = vst [vmem:[%s1596_s7 + $0x78] sm:$0xff] %v640_v48 }
 0x1a0 PF: > { %s842_s23 = sshll.u32 %s1297_s30, 11  ;;  %s672_s10 = sshll.u32 %s1596_s7, 4  ;;  %s1685_s10 = int_to_ptr.vmem [resolvable:$true] %s672_s10 }
 0x1a1   : > { %s1682_s8 = scalar_lea.hbm %s1756_s4, %s842_s23  ;;  %s1689_s27 = scalar_lea.sflag [#allocation7], %s250_s21 }
 0x1a2   : > { %s1171_s11 = scalar_lea.vmem %s1685_s10, 2048  ;;  %p1791_p13 = scmp.ne.s32.totalorder %s1775_s19, 0 }
 0x1a3   : > { %p1172_p10 = scmp.ne.s32.totalorder %s1685_s10, %s1171_s11  ;;  %s1316_s30 = smov [#allocation10]  }
 0x1a4   : > { %s1175_s16 = sshll.u32 %s1316_s30, 4  ;;  %s1176_s16 = int_to_ptr.vmem [resolvable:$false] %s1175_s16 }
 0x1a5   : > { %p1173_p1 = pnand %p1172_p10, %p1791_p13  ;;  %s1177_s12 = scalar_lea.vmem %s1176_s16, 4096 }
 0x1a6   : > { %p1178_p9 = scmp.lt.s32.totalorder %s1685_s10, %s1176_s16  ;;  %p1179_p2 = scmp.lt.s32.totalorder %s1177_s12, %s1171_s11 }
 0x1a7   : > { %p1174_p4 = pneg %p1173_p1 }
 0x1a8   : > { %p1180_p11 = por %p1179_p2, %p1178_p9 }
 0x1aa   : > { %p1181_p3 = pnand %p1180_p11, %p1174_p4 }
 0x1ac   : > { %1184 = shalt.err (!%p1181_p3)
}
 0x1ad   : > { %s1185_s20 = scalar_lea.hbm %s1682_s8, 2048  ;;  %s1189_s14 = scalar_lea.hbm %s1756_s4, 4096 }
 0x1ae   : > { %p1186_p0 = scmp.ne.s32.totalorder %s1682_s8, %s1185_s20  ;;  %p1190_p7 = scmp.lt.s32.totalorder %s1682_s8, %s1756_s4 }
 0x1af   : > { %p1191_p6 = scmp.lt.s32.totalorder %s1189_s14, %s1185_s20 }
 0x1b0   : > { %p1187_p5 = pnand %p1186_p0, %p1791_p13 }
 0x1b1   : > { %p1192_p12 = por %p1191_p6, %p1190_p7 }
 0x1b2   : > { %p1188_p8 = pneg %p1187_p5 }
 0x1b4   : > { %p1193_p10 = pnand %p1192_p12, %p1188_p8 }
 0x1b6   : > { %1196 = shalt.err (!%p1193_p10)
}
 0x1b7   : > { %s1317_s18 = smov 128   ;;  %s1318_s17 = smov 8  }
 0x1b8   : > { %931 = dma.vmem_to_hbm [thread:$0]  (%p1791_p13), %s1685_s10, 2048, %s1682_s8, %s1689_s27, %s1317_s18, %s1317_s18, %s1318_s17  }
 0x1b9 PF: > { %s1792_s7 = sld [smem:[#allocation19_spill]]  ;;  %p1795_p4 = scmp.ge.s32.totalorder %s1305_s6, 2 }
 0x1ba   : > { %s1793_s23 = sld [smem:[#allocation23_spill]] }
 0x1bf   : > { %s687_s22 = sand.u32 1, %s1792_s7  }
 0x1c0   : > { %p1794_p1 = scmp.ne.s32.totalorder %s1793_s23, 0  ;;  %s688_s13 = scalar_lea.sflag [#allocation7], %s687_s22 }
 0x1c2   : > { %p945_p9 = pnand %p1795_p4, %p1794_p1 }
 0x1c4   : > { %p946_p2 = pneg %p945_p9 }
 0x1c6   : > { %1256 = dma.done.wait (%p946_p2), %s688_s13, 2048  }
 0x1c7   : > { %1258 = vsyncadd (%p946_p2), %s688_s13, 4294965248  ;;  %s31_s6 = sadd.s32 1, %s1305_s6   ;;  %s1796_s11 = sld [smem:[#allocation20_spill]] }
 0x1c8   : > { %p28_p11 = scmp.ge.s32.totalorder %s31_s6, 4   ;;  %s1797_s23 = sld [smem:[#allocation22_spill]] }
 0x1c9   : > { %s1798_s19 = sld [smem:[#allocation21_spill]]  ;;  %s1800_s0 = smov %s1265_s1 }
 0x1ca   : > { %s1799_s8 = sld [smem:[#allocation24_spill]]  ;;  %s1802_s24 = smov %s1277_s25 }
 0x1cb   : > { %s1803_s25 = smov %s1281_s26  ;;  %s1804_s26 = smov %s1535_s29 }
 0x1cc   : > { %s1805_s27 = smov %s1289_s28  ;;  %s1808_s30 = smov %s1301_s5 }
 0x1cd   : > { %s1801_s1 = smov %s1796_s11  ;;  %s1809_s5 = smov %s1811_s9 }
 0x1ce   :  { %30 = sbr.rel (!%p28_p11) target bundleno = 27 (0x1b), region = 94 }
 0x1cf   : > { %s1806_s28 = smov %s1798_s19 }
 0x1d0   : > { %s1807_s29 = smov %s1799_s8 }
 0x1d3   :  { %693 = vsyncpa [#allocation6], 1 }
 0x1d4   :  { %695 = vsyncpa [#allocation6 + $0x1], 1 }
 0x1d5   :  { %696 = vsyncpa [#allocation9], 1 }
 0x1d6   :  { %698 = vsyncpa [#allocation9 + $0x1], 1 }
 0x1d7   :  { %699 = vsyncpa [#allocation7], 1 }
 0x1d8   :  { %701 = vsyncpa [#allocation7 + $0x1], 1 }

</bundles_post_ra>
